<compile_context>
chip_gen: v7x
topology: tpu7x:2x2x1
jax: 0.10.0
libtpu: 0.0.40
codegen_flags: <defaults>
</compile_context>

<pallas_src>
import math

import jax
import jax.numpy as jnp
from jax.experimental import pallas as pl
from jax.experimental.pallas import tpu as pltpu

NEG_SLOPE = 0.01   # nn.LeakyReLU default negative_slope
BN_EPS = 1e-5      # nn.BatchNorm1d default eps


def _round_up(x, m):
    return ((x + m - 1) // m) * m


# ---------------------------------------------------------------------------
# Parameter preprocessing (done ONCE, outside the hot path).
# ---------------------------------------------------------------------------
def _fold_bn(w, b, gamma, beta, mean, var, eps=BN_EPS):
    """Fold eval-mode BatchNorm1d into the preceding Linear.
    w is stored pre-transposed as (in_features, out_features)."""
    s = gamma / jnp.sqrt(var + eps)
    return w * s[None, :], (b - mean) * s + beta


def prepare_params(params, *, compute_dtype=jnp.bfloat16):
    """Fold BN into the emb Linears, then fold both emb Linears into dense1
    (purely affine chain in eval mode). Returns the small set of effective
    weights the kernel needs. Call once per model."""
    fil_num = params["dense1"]["w"].shape[1]

    wm, bm = _fold_bn(params["mri_emb"]["w"], params["mri_emb"]["b"],
                      params["mri_emb"]["gamma"], params["mri_emb"]["beta"],
                      params["mri_emb"]["mean"], params["mri_emb"]["var"])
    wn, bn = _fold_bn(params["nonimg_emb"]["w"], params["nonimg_emb"]["b"],
                      params["nonimg_emb"]["gamma"], params["nonimg_emb"]["beta"],
                      params["nonimg_emb"]["mean"], params["nonimg_emb"]["var"])

    w1 = params["dense1"]["w"]                     # (2*fil_num, fil_num)
    w1m, w1n = w1[:fil_num, :], w1[fil_num:, :]
    b1 = params["dense1"]["b"]

    # emb -> dense1 fold (mathematically identical to BN(emb) then dense1).
    wa = wm @ w1m                                  # (mri_size,    fil_num)
    wc = wn @ w1n                                  # (nonImg_size, fil_num)
    bf = bm @ w1m + bn @ w1n + b1                  # (fil_num,)

    return dict(
        wa=wa.astype(compute_dtype),
        # nonImg path stays f32: exact for integer inputs (mirrors .float()),
        # and this tiny matmul costs nothing.
        wc=wc.astype(jnp.float32),
        bf=bf.reshape(1, -1).astype(jnp.float32),
        w2=params["dense2"]["w"].astype(compute_dtype),
        b2=params["dense2"]["b"].reshape(1, -1).astype(jnp.float32),
    )


# ---------------------------------------------------------------------------
# Kernel
# ---------------------------------------------------------------------------
def mlp3_kernel(mri_ref, nonimg_ref, wa_ref, wc_ref, bf_ref, w2_ref, b2_ref,
                o_ref):
    cdt = wa_ref.dtype  # MXU compute dtype (f32 or bf16); accumulate in f32.

    # dense1 on the (never materialized) concat of the two folded emb layers.
    d1 = (jnp.dot(mri_ref[...].astype(cdt), wa_ref[...],
                  preferred_element_type=jnp.float32)
          + jnp.dot(nonimg_ref[...].astype(jnp.float32), wc_ref[...],
                    preferred_element_type=jnp.float32)
          + bf_ref[...])

    # dense2: LeakyReLU (single VALU max) -> Linear.
    act = jnp.maximum(d1, NEG_SLOPE * d1)
    out = jnp.dot(act.astype(w2_ref.dtype), w2_ref[...],
                  preferred_element_type=jnp.float32) + b2_ref[...]

    o_ref[...] = out.astype(o_ref.dtype)


# ---------------------------------------------------------------------------
# Wrapper
# ---------------------------------------------------------------------------
def mlp3_forward(mri, nonimg, prep, *, block_rows=2048, core_parallel=False):
    """mri: (B, mri_size) f32/bf16; nonimg: (B, nonImg_size), any dtype (cast
    in-kernel like PyTorch's .float()); prep: output of prepare_params().
    core_parallel=True maps the batch grid axis to CORE_PARALLEL (v7x, 2 TCs);
    default 'parallel' is safe on every generation."""
    B, mri_size = mri.shape
    nonimg_size = nonimg.shape[1]
    fil_num = prep["wa"].shape[1]
    out_size = prep["w2"].shape[1]

    # Batch tile: large (amortizes the ~0.35us per-grid-step overhead),
    # sublane-aligned (16 covers bf16 packing, and is a multiple of f32's 8),
    # and with an even step count when tiled so a 2-TC chip splits evenly.
    align = 16 if prep["wa"].dtype == jnp.bfloat16 else 8
    if B <= block_rows:
        steps = 1
    else:
        steps = pl.cdiv(B, block_rows)
        steps += steps % 2                       # even number of grid steps
    tm = _round_up(max(pl.cdiv(B, steps), 1), align)
    grid = (pl.cdiv(B, tm),)

    def row_spec(cols):
        return pl.BlockSpec((tm, cols), lambda i: (i, 0))

    def const_spec(arr):  # weights / biases: DMA'd once, stay VMEM-resident
        return pl.BlockSpec(arr.shape, lambda i: (0, 0))

    weights = (prep["wa"], prep["wc"], prep["bf"], prep["w2"], prep["b2"])

    flops = 2 * B * fil_num * (mri_size + nonimg_size + out_size)
    bytes_accessed = (mri.size * mri.dtype.itemsize
                      + nonimg.size * nonimg.dtype.itemsize
                      + B * out_size * 4
                      + sum(w.size * w.dtype.itemsize for w in weights))

    sem = pltpu.CORE_PARALLEL if core_parallel else "parallel"

    return pl.pallas_call(
        mlp3_kernel,
        out_shape=jax.ShapeDtypeStruct((B, out_size), jnp.float32),
        grid=grid,
        in_specs=[row_spec(mri_size), row_spec(nonimg_size)]
                 + [const_spec(w) for w in weights],
        out_specs=row_spec(out_size),
        compiler_params=pltpu.CompilerParams(
            dimension_semantics=(sem,),
            vmem_limit_bytes=16 * 1024 * 1024,   # live footprint is only ~MiBs
        ),
        cost_estimate=pl.CostEstimate(
            flops=flops, transcendentals=0, bytes_accessed=bytes_accessed),
    )(mri, nonimg, *weights)


# ---------------------------------------------------------------------------
# Pure-JAX reference (mirrors the PyTorch module in eval mode, unfolded)
# ---------------------------------------------------------------------------
def reference_forward(mri, nonimg, params):
    def batchnorm(h, p):
        return (h - p["mean"]) / jnp.sqrt(p["var"] + BN_EPS) * p["gamma"] + p["beta"]

    h_m = batchnorm(mri.astype(jnp.float32) @ params["mri_emb"]["w"]
                    + params["mri_emb"]["b"], params["mri_emb"])
    h_n = batchnorm(nonimg.astype(jnp.float32) @ params["nonimg_emb"]["w"]
                    + params["nonimg_emb"]["b"], params["nonimg_emb"])
    z = jnp.concatenate([h_m, h_n], axis=1)
    d1 = z @ params["dense1"]["w"] + params["dense1"]["b"]
    act = jnp.where(d1 >= 0, d1, NEG_SLOPE * d1)
    return act @ params["dense2"]["w"] + params["dense2"]["b"]


if __name__ == "__main__":
    # Small shapes consistent with the module's forward.
    B, mri_size, nonimg_size = 4, 32, 8
    fil_num, out_size = 16, 4       # config['fil_num'], config['out_size']

    key = jax.random.PRNGKey(0)
    ks = jax.random.split(key, 20)

    def linear_init(kw, kb, fan_in, fan_out):
        bound = 1.0 / math.sqrt(fan_in)
        w = jax.random.uniform(kw, (fan_in, fan_out), jnp.float32, -bound, bound)
        b = jax.random.uniform(kb, (fan_out,), jnp.float32, -bound, bound)
        return w, b

    def bn_init(kg, kb, km, kv, n):
        return dict(gamma=jax.random.uniform(kg, (n,), jnp.float32, 0.5, 1.5),
                    beta=0.1 * jax.random.normal(kb, (n,), jnp.float32),
                    mean=0.1 * jax.random.normal(km, (n,), jnp.float32),
                    var=jax.random.uniform(kv, (n,), jnp.float32, 0.5, 1.5))

    wm, bm = linear_init(ks[0], ks[1], mri_size, fil_num)
    wn, bn = linear_init(ks[2], ks[3], nonimg_size, fil_num)
    w1, b1 = linear_init(ks[4], ks[5], 2 * fil_num, fil_num)
    w2, b2 = linear_init(ks[6], ks[7], fil_num, out_size)

    params = {
        "mri_emb":    dict(w=wm, b=bm, **bn_init(ks[8], ks[9], ks[10], ks[11], fil_num)),
        "nonimg_emb": dict(w=wn, b=bn, **bn_init(ks[12], ks[13], ks[14], ks[15], fil_num)),
        "dense1":     dict(w=w1, b=b1),
        "dense2":     dict(w=w2, b=b2),
    }

    mri = jax.random.normal(ks[16], (B, mri_size), dtype=jnp.float32)
    # nonImg mirrors PyTorch's nonImg.float(): int dtype, cast in-kernel.
    nonimg = jax.random.randint(ks[17], (B, nonimg_size), minval=-3, maxval=4,
                                dtype=jnp.int32)

    # --- f32 path, small batch --------------------------------------------
    prep_f32 = prepare_params(params, compute_dtype=jnp.float32)
    out = jax.block_until_ready(mlp3_forward(mri, nonimg, prep_f32))
    ref = reference_forward(mri, nonimg, params)
    assert out.shape == (B, out_size), out.shape
    assert jnp.allclose(out, ref, atol=1e-4, rtol=1e-4), \
        float(jnp.max(jnp.abs(out - ref)))

    # --- f32 path, larger batch: exercises the pipelined batch grid with an
    # even step count and a partial final tile (2500 rows -> 2 x 1256) -------
    Bb = 2500
    mri_b = jax.random.normal(ks[18], (Bb, mri_size), dtype=jnp.float32)
    nonimg_b = jax.random.randint(ks[19], (Bb, nonimg_size), minval=-3, maxval=4,
                                  dtype=jnp.int32)
    out_b = jax.block_until_ready(
        mlp3_forward(mri_b, nonimg_b, prep_f32, block_rows=2048))
    ref_b = reference_forward(mri_b, nonimg_b, params)
    assert out_b.shape == (Bb, out_size), out_b.shape
    assert jnp.allclose(out_b, ref_b, atol=1e-4, rtol=1e-4), \
        float(jnp.max(jnp.abs(out_b - ref_b)))

    # --- default bf16 operand path (halves the dominant mri HBM stream;
    # f32 accumulation, f32 nonImg path) -------------------------------------
    prep_bf16 = prepare_params(params)                 # compute_dtype=bf16
    out_bf = jax.block_until_ready(
        mlp3_forward(mri.astype(jnp.bfloat16), nonimg, prep_bf16))
    assert jnp.allclose(out_bf, ref, atol=5e-2, rtol=5e-2), \
        float(jnp.max(jnp.abs(out_bf - ref)))

    out_bf_b = jax.block_until_ready(
        mlp3_forward(mri_b.astype(jnp.bfloat16), nonimg_b, prep_bf16))
    assert jnp.allclose(out_bf_b, ref_b, atol=5e-2, rtol=5e-2), \
        float(jnp.max(jnp.abs(out_bf_b - ref_b)))

    print("KERNEL_OK")
</pallas_src>

<mosaic_0001>
module attributes {stable_mosaic.version = 11 : i64} {
  func.func @mlp3_kernel(%arg0: i32, %arg1: memref<8x32xf32, #tpu.memory_space<vmem>>, %arg2: memref<8x8xi32, #tpu.memory_space<vmem>>, %arg3: memref<32x16xf32, #tpu.memory_space<vmem>>, %arg4: memref<8x16xf32, #tpu.memory_space<vmem>>, %arg5: memref<1x16xf32, #tpu.memory_space<vmem>>, %arg6: memref<16x4xf32, #tpu.memory_space<vmem>>, %arg7: memref<1x4xf32, #tpu.memory_space<vmem>>, %arg8: memref<8x4xf32, #tpu.memory_space<vmem>>) attributes {dimension_semantics = [#tpu.dimension_semantics<parallel>], iteration_bounds = array<i64: 1>, scalar_prefetch = 0 : i64, scratch_operands = 0 : i64, tpu.core_type = #tpu.core_type<tc>, window_params = [{transform_indices = @transform_0, window_bounds = array<i64: 8, 32>}, {transform_indices = @transform_1, window_bounds = array<i64: 8, 8>}, {pipeline_mode = #tpu.pipeline_mode<synchronous>, transform_indices = @transform_2, window_bounds = array<i64: 32, 16>}, {pipeline_mode = #tpu.pipeline_mode<synchronous>, transform_indices = @transform_3, window_bounds = array<i64: 8, 16>}, {pipeline_mode = #tpu.pipeline_mode<synchronous>, transform_indices = @transform_4, window_bounds = array<i64: 1, 16>}, {pipeline_mode = #tpu.pipeline_mode<synchronous>, transform_indices = @transform_5, window_bounds = array<i64: 16, 4>}, {pipeline_mode = #tpu.pipeline_mode<synchronous>, transform_indices = @transform_6, window_bounds = array<i64: 1, 4>}, {transform_indices = @transform_7, window_bounds = array<i64: 8, 4>}]} {
    %c0 = arith.constant 0 : index
    %c0_0 = arith.constant 0 : index
    %0 = vector.load %arg1[%c0, %c0_0] : memref<8x32xf32, #tpu.memory_space<vmem>>, vector<8x32xf32>
    %c0_1 = arith.constant 0 : index
    %c0_2 = arith.constant 0 : index
    %1 = vector.load %arg3[%c0_1, %c0_2] : memref<32x16xf32, #tpu.memory_space<vmem>>, vector<32x16xf32>
    %cst = arith.constant dense<0.000000e+00> : vector<8x16xf32>
    %2 = tpu.matmul %0, %1, %cst {dimension_numbers = #tpu.dot_dimension_numbers<[1], [0], [0], [1], [0, 0, 1, 1], [], []>} : vector<8x32xf32>, vector<32x16xf32>, vector<8x16xf32> -> vector<8x16xf32>
    %c0_3 = arith.constant 0 : index
    %c0_4 = arith.constant 0 : index
    %3 = vector.load %arg2[%c0_3, %c0_4] : memref<8x8xi32, #tpu.memory_space<vmem>>, vector<8x8xi32>
    %4 = arith.sitofp %3 : vector<8x8xi32> to vector<8x8xf32>
    %c0_5 = arith.constant 0 : index
    %c0_6 = arith.constant 0 : index
    %5 = vector.load %arg4[%c0_5, %c0_6] : memref<8x16xf32, #tpu.memory_space<vmem>>, vector<8x16xf32>
    %cst_7 = arith.constant dense<0.000000e+00> : vector<8x16xf32>
    %6 = tpu.matmul %4, %5, %cst_7 {dimension_numbers = #tpu.dot_dimension_numbers<[1], [0], [0], [1], [0, 0, 1, 1], [], []>} : vector<8x8xf32>, vector<8x16xf32>, vector<8x16xf32> -> vector<8x16xf32>
    %7 = arith.addf %2, %6 : vector<8x16xf32>
    %c0_8 = arith.constant 0 : index
    %c0_9 = arith.constant 0 : index
    %8 = vector.load %arg5[%c0_8, %c0_9] : memref<1x16xf32, #tpu.memory_space<vmem>>, vector<1x16xf32>
    %9 = vector.broadcast %8 : vector<1x16xf32> to vector<8x16xf32>
    %10 = arith.addf %7, %9 : vector<8x16xf32>
    %cst_10 = arith.constant 0.00999999977 : f32
    %11 = vector.broadcast %cst_10 : f32 to vector<8x16xf32>
    %12 = arith.mulf %11, %10 : vector<8x16xf32>
    %13 = arith.maximumf %10, %12 : vector<8x16xf32>
    %c0_11 = arith.constant 0 : index
    %c0_12 = arith.constant 0 : index
    %14 = vector.load %arg6[%c0_11, %c0_12] : memref<16x4xf32, #tpu.memory_space<vmem>>, vector<16x4xf32>
    %cst_13 = arith.constant dense<0.000000e+00> : vector<8x4xf32>
    %15 = tpu.matmul %13, %14, %cst_13 {dimension_numbers = #tpu.dot_dimension_numbers<[1], [0], [0], [1], [0, 0, 1, 1], [], []>} : vector<8x16xf32>, vector<16x4xf32>, vector<8x4xf32> -> vector<8x4xf32>
    %c0_14 = arith.constant 0 : index
    %c0_15 = arith.constant 0 : index
    %16 = vector.load %arg7[%c0_14, %c0_15] : memref<1x4xf32, #tpu.memory_space<vmem>>, vector<1x4xf32>
    %17 = vector.broadcast %16 : vector<1x4xf32> to vector<8x4xf32>
    %18 = arith.addf %15, %17 : vector<8x4xf32>
    %c0_16 = arith.constant 0 : index
    %c0_17 = arith.constant 0 : index
    %19 = vector.load %arg8[%c0_16, %c0_17] : memref<8x4xf32, #tpu.memory_space<vmem>>, vector<8x4xf32>
    tpu.vector_store %arg8[%c0_16, %c0_17], %18 {strides = array<i32>} : memref<8x4xf32, #tpu.memory_space<vmem>>, vector<8x4xf32>,
    return
  }
  func.func @transform_0(%arg0: i32) -> (i32, i32) {
    %c0_i32 = arith.constant 0 : i32
    %c0_i32_0 = arith.constant 0 : i32
    return %arg0, %c0_i32 : i32, i32
  }
  func.func @transform_1(%arg0: i32) -> (i32, i32) {
    %c0_i32 = arith.constant 0 : i32
    %c0_i32_0 = arith.constant 0 : i32
    return %arg0, %c0_i32 : i32, i32
  }
  func.func @transform_2(%arg0: i32) -> (i32, i32) {
    %c0_i32 = arith.constant 0 : i32
    %c0_i32_0 = arith.constant 0 : i32
    %c0_i32_1 = arith.constant 0 : i32
    return %c0_i32, %c0_i32_0 : i32, i32
  }
  func.func @transform_3(%arg0: i32) -> (i32, i32) {
    %c0_i32 = arith.constant 0 : i32
    %c0_i32_0 = arith.constant 0 : i32
    %c0_i32_1 = arith.constant 0 : i32
    return %c0_i32, %c0_i32_0 : i32, i32
  }
  func.func @transform_4(%arg0: i32) -> (i32, i32) {
    %c0_i32 = arith.constant 0 : i32
    %c0_i32_0 = arith.constant 0 : i32
    %c0_i32_1 = arith.constant 0 : i32
    return %c0_i32, %c0_i32_0 : i32, i32
  }
  func.func @transform_5(%arg0: i32) -> (i32, i32) {
    %c0_i32 = arith.constant 0 : i32
    %c0_i32_0 = arith.constant 0 : i32
    %c0_i32_1 = arith.constant 0 : i32
    return %c0_i32, %c0_i32_0 : i32, i32
  }
  func.func @transform_6(%arg0: i32) -> (i32, i32) {
    %c0_i32 = arith.constant 0 : i32
    %c0_i32_0 = arith.constant 0 : i32
    %c0_i32_1 = arith.constant 0 : i32
    return %c0_i32, %c0_i32_0 : i32, i32
  }
  func.func @transform_7(%arg0: i32) -> (i32, i32) {
    %c0_i32 = arith.constant 0 : i32
    %c0_i32_0 = arith.constant 0 : i32
    return %arg0, %c0_i32 : i32, i32
  }
}

</mosaic_0001>

<bundles_post_ra>
// kernel: tpu_custom_call.1
= control target key start
LH: loop header
LB: loop body
LE: loop exit
PB: predicated region body
PF: predicated region fallthrough
CT: control target
= control target key end

     0   :  { %s462_s0 = inlined_call_operand.vmem [shape: f32[4,32], index: 0, kind: input, shape index: {}]   ;;  %s463_s1 = inlined_call_operand.vmem [shape: s32[4,8], index: 1, kind: input, shape index: {}]   ;;  %s464_s2 = inlined_call_operand.vmem [shape: f32[32,16], index: 2, kind: input, shape index: {}]   ;;  %s465_s3 = inlined_call_operand.vmem [shape: f32[8,16], index: 3, kind: input, shape index: {}]   ;;  %s466_s4 = inlined_call_operand.vmem [shape: f32[1,16], index: 4, kind: input, shape index: {}]   ;;  %s467_s5 = inlined_call_operand.vmem [shape: f32[16,4], index: 5, kind: input, shape index: {}]   ;;  %s468_s6 = inlined_call_operand.vmem [shape: f32[1,4], index: 6, kind: input, shape index: {}]   ;;  %s469_s7 = inlined_call_operand.hbm [shape: f32[4,4], index: 7, kind: output, shape index: {}]  }
   0x1   :  { %v28_v0 = vld [vmem:[%s464_s2] sm:$0xff]  ;;  %v29_v1 = vld [vmem:[%s464_s2 + $0x8] sm:$0xff] }
   0x2   :  { %12 = vsyncpa [#allocation3], 0  ;;  %v371_v2 = vmov 0.0|0.0   ;;  %v333_v3 = vpack.c.bf16 %v29_v1, %v28_v0  ;;  %v372_v4 = vmov 0.0   ;;  %v30_v5 = vld [vmem:[%s464_s2 + $0x10] sm:$0xff]  ;;  %v31_v6 = vld [vmem:[%s464_s2 + $0x18] sm:$0xff] }
   0x3   :  { %332 = vmatprep.subr.bf16.mxu1 %v371_v2  ;;  %309 = vmatprep.subr.mxu0 %v372_v4  ;;  %v34_v7 = vld [vmem:[%s465_s3] sm:$0xff]  ;;  %vm373_vm0 = vmmov 0   ;;  %vm35_vm1 = vcmask 64512   ;;  %v336_v9 = vpack.c.bf16 %v31_v6, %v30_v5  ;;  %vm109_vm2 = vcmask 261120   ;;  %v194_v13 = vld [vmem:[%s467_s5 + $0x8] sm:$0xff] }
   0x4   :  { %310 = vmatpush3.msra.mxu0 %v34_v7  ;;  %311 = vmatprep.mubr.msk.f32.mxu0 %vm373_vm0, %v372_v4  ;;  %v32_v8 = vld [vmem:[%s463_s1] sm:$0xff]  ;;  %vm202_vm3 = vcmask 130048   ;;  %vm276_vm4 = vcmask 31744  }
   0x5   :  { %334 = vmatpush3.bf16.msra.mxu1 %v333_v3  ;;  %v33_v10 = vcvt.s32.f32 %v32_v8  ;;  %322 = vmatprep.mubr.msk.f32.mxu1 %vm373_vm0, %v372_v4  ;;  %v27_v11 = vld [vmem:[%s462_s0] sm:$0xff] }
   0x6   :  { %335 = vmatprep.subr.bf16.mxu1 %v371_v2  ;;  %338 = vmatprep.subr.bf16.mxu0 %v371_v2  ;;  %v193_v12 = vld [vmem:[%s467_s5] sm:$0xff] }
   0x7   :  { %312 = vmatmul.mubr.msk.f32.vlgmr.msra.gmra.mrb[0].mxu0 %vm35_vm1, %v33_v10  ;;  %v339_v14 = vpack.c.bf16 %v194_v13, %v193_v12  ;;  %v296_v18 = vld [vmem:[%s466_s4] ss:$0 sm:$0xff] }
   0x8   :  { %329 = vmatprep.mubr.msk.f32.mxu0 %vm373_vm0, %v372_v4  ;;  %v297_v24 = vld [vmem:[%s468_s6] ss:$0 sm:$0xff] }
   0x9   :  { %337 = vmatpush3.bf16.msra.mxu1 %v336_v9  ;;  %340 = vmatpush3.bf16.msra.mxu0 %v339_v14 }
   0xc   :  { %323 = vmatmul.mubr.msk.f32.vlgmr.msra.gmra.mrb[0].mxu1 %vm109_vm2, %v27_v11 }
  0xda   :  { %v105_v15 = vpop.f32.mrb[0].mxu0 }
  0xdb   :  { %v313_v16 = vpop.f32.mrb[1].mxu0 }
  0xdf   :  { %v179_v17 = vpop.f32.mrb[0].mxu1 }
  0xe0   :  { %v180_v19 = vadd.f32 %v179_v17, %v105_v15  ;;  %v324_v20 = vpop.f32.mrb[1].mxu1 }
  0xe2   :  { %v190_v21 = vadd.f32 %v296_v18, %v180_v19 }
  0xe4   :  { %v191_v22 = vmul.f32 0.01, %v190_v21 }
  0xe6   :  { %v192_v23 = vmax.f32 %v190_v21, %v191_v22 }
  0xe8   :  { %330 = vmatmul.mubr.msk.f32.vlgmr.msra.gmra.mrb[2].mxu0 %vm202_vm3, %v192_v23 }
 0x1bb   :  { %v272_v25 = vpop.f32.mrb[2].mxu0 }
 0x1bc   :  { %v273_v26 = vadd.f32 %v297_v24, %v272_v25  ;;  %v331_v27 = vpop.f32.mrb[3].mxu0 }
 0x1be   :  { %277 = vst.msk [vmem:[#allocation2] sm:$0xff] %vm276_vm4, %v273_v26 }
 0x1bf   :  { %282 = vsyncadd [#allocation3], 64  ;;  %s374_s5 = smov [#allocation2]  }
 0x1c0   :  { %s283_s19 = sshll.u32 %s374_s5, 4  ;;  %s284_s19 = int_to_ptr.vmem [resolvable:$true] %s283_s19 }
 0x1c1   :  { %s347_s4 = scalar_lea.vmem %s284_s19, 64  ;;  %s351_s20 = scalar_lea.vmem %s284_s19, 128 }
 0x1c2   :  { %p348_p0 = scmp.ne.s32.totalorder %s284_s19, %s347_s4  ;;  %p352_p1 = scmp.lt.s32.totalorder %s284_s19, %s284_s19 }
 0x1c3   :  { %p353_p2 = scmp.lt.s32.totalorder %s351_s20, %s347_s4 }
 0x1c5   :  { %p354_p3 = por %p353_p2, %p352_p1 }
 0x1c7   :  { %p355_p4 = pnand %p354_p3, %p348_p0 }
 0x1c9   :  { %358 = shalt.err (!%p355_p4)
}
 0x1ca   :  { %s359_s6 = scalar_lea.hbm %s469_s7, 64 }
 0x1cb   :  { %p360_p5 = scmp.ne.s32.totalorder %s469_s7, %s359_s6  ;;  %p363_p6 = scmp.lt.u32.totalorder %s359_s6, %s469_s7 }
 0x1cd   :  { %p365_p7 = pnand %p363_p6, %p360_p5 }
 0x1cf   :  { %368 = shalt.err (!%p365_p7)
}
 0x1d0   :  { %s375_s27 = smov 64   ;;  %s376_s28 = smov 4  }
 0x1d1   :  { %289 = dma.vmem_to_hbm [thread:$0]  %s284_s19, 64, %s469_s7, [#allocation3], %s375_s27, %s375_s27, %s376_s28  }
 0x1d2   :  { %369 = dma.done.wait [#allocation3], 128  }
 0x1d3   :  { %370 = vsyncadd [#allocation3], 4294967168 }
 0x1d4   :  { %293 = vsyncpa [#allocation3], 1 }

</bundles_post_ra>
